<compile_context>
chip_gen: v7x
topology: tpu7x:2x2x1
jax: 0.10.0
libtpu: 0.0.40
codegen_flags: <defaults>
</compile_context>

<pallas_src>
import functools

import jax
import jax.numpy as jnp
from jax.experimental import pallas as pl
from jax.experimental.pallas import tpu as pltpu


def _ensemble_kernel(x_ref, w_ref, b_ref, o_ref, *, mode, g, C):
    x = x_ref[...].astype(jnp.float32)          # (tile_rows, g*C)
    w = w_ref[...].astype(jnp.float32)          # (1, g*C) -> broadcasts over rows
    b = b_ref[...].astype(jnp.float32)          # (1, g*C)

    if mode == "normal":
        o_ref[...] = (x * w + b).astype(o_ref.dtype)
        return

    def seg_reduce(y, op):
        """Per-logical-row (C-wide lane segment) reduction, broadcast back."""
        if g == 1:
            return op(y, axis=-1, keepdims=True)          # (T, 1), broadcasts
        parts = []
        for k in range(g):                                # static unroll, g <= 64
            seg = y[:, k * C:(k + 1) * C]                 # static lane slice
            red = op(seg, axis=-1, keepdims=True)         # (T, 1)
            parts.append(jnp.broadcast_to(red, seg.shape))
        return jnp.concatenate(parts, axis=-1)            # (T, g*C)

    if mode == "additive":
        # x = x * exp(w) + exp(b); x /= x.sum(1, keepdim); return log(x + 1e-6)
        y = x * jnp.exp(w) + jnp.exp(b)
        denom = seg_reduce(y, jnp.sum)
        # log(y/denom + 1e-6) == log(y + 1e-6*denom) - log(denom): no per-elem divide.
        o_ref[...] = (jnp.log(y + 1e-6 * denom) - jnp.log(denom)).astype(o_ref.dtype)
    elif mode == "geometric":
        # x = x * exp(w); return log_softmax(x, -1) + b
        y = x * jnp.exp(w)
        m = seg_reduce(y, jnp.max)
        s = y - m
        lse = jnp.log(seg_reduce(jnp.exp(s), jnp.sum))
        o_ref[...] = (s - lse + b).astype(o_ref.dtype)
    else:
        raise ValueError(f"unknown ensemble_mode: {mode}")


def ensemble_layer(x, weight, bias, ensemble_mode, *, block_rows=512):
    """Pallas TPU implementation of the PyTorch ensemble_layer forward.

    x:      (N, C)
    weight: (1, C)
    bias:   (1, C)
    """
    N, C = x.shape
    assert weight.shape == (1, C) and bias.shape == (1, C)

    # Lane folding factor: pack g rows into the 128-lane axis when C < 128.
    g = (128 // C) if (C < 128 and 128 % C == 0) else 1
    Cf = g * C

    # Folded-row tile: multiple of 8 rows, capped so double-buffered in+out
    # f32 tiles stay well under the smallest (v5e, 16 MiB) scoped-VMEM default.
    max_tile_elems = 512 * 1024
    bn_cap = max(8, (max_tile_elems // max(Cf, 1)) // 8 * 8)
    n_folded = pl.cdiv(N, g)
    bn = min(block_rows, bn_cap, ((n_folded + 7) // 8) * 8)
    bn = max(8, (bn // 8) * 8)

    nf_pad = ((n_folded + bn - 1) // bn) * bn
    n_pad = nf_pad * g

    xp = jnp.pad(x, ((0, n_pad - N), (0, 0))) if n_pad != N else x
    xf = xp.reshape(nf_pad, Cf)
    wf = jnp.tile(weight, (1, g)) if g > 1 else weight
    bf = jnp.tile(bias, (1, g)) if g > 1 else bias

    # Raise the scoped-VMEM limit only if the estimate needs it (headroom vs
    # the 64 MiB physical VMEM on v7x).
    est_vmem = 4 * bn * Cf * x.dtype.itemsize + 8 * Cf * 4
    vmem_limit = None
    if est_vmem > 12 * 1024 * 1024:
        vmem_limit = min(int(est_vmem * 1.5), 56 * 1024 * 1024)

    kernel = functools.partial(_ensemble_kernel, mode=ensemble_mode, g=g, C=C)

    out = pl.pallas_call(
        kernel,
        out_shape=jax.ShapeDtypeStruct((nf_pad, Cf), x.dtype),
        grid=(nf_pad // bn,),
        in_specs=[
            pl.BlockSpec((bn, Cf), lambda i: (i, 0)),    # x tile (lane-dense)
            pl.BlockSpec((1, Cf), lambda i: (0, 0)),     # weight (replicated)
            pl.BlockSpec((1, Cf), lambda i: (0, 0)),     # bias   (replicated)
        ],
        out_specs=pl.BlockSpec((bn, Cf), lambda i: (i, 0)),
        compiler_params=pltpu.CompilerParams(
            dimension_semantics=("parallel",),           # megacore sharding on v7x
            vmem_limit_bytes=vmem_limit,
        ),
    )(xf, wf, bf)

    out = out.reshape(n_pad, C)
    return out[:N] if n_pad != N else out


def _reference(x, weight, bias, mode):
    if mode == "additive":
        y = x * jnp.exp(weight) + jnp.exp(bias)
        y = y / jnp.sum(y, axis=1, keepdims=True)
        return jnp.log(y + 1e-6)
    elif mode == "geometric":
        y = x * jnp.exp(weight)
        return jax.nn.log_softmax(y, axis=-1) + bias
    elif mode == "normal":
        return x * weight + bias


if __name__ == "__main__":
    key = jax.random.PRNGKey(0)
    k1, k2, k3, k4 = jax.random.split(key, 4)
    ok = True

    # Case 1: C=32 (lane-folded path, g=4), tiny batch exercising padding.
    N, C = 8, 32
    x = jax.nn.softmax(jax.random.normal(k1, (N, C), dtype=jnp.float32), axis=-1)
    weight = jax.random.normal(k2, (1, C), dtype=jnp.float32)
    bias = jnp.zeros((1, C), dtype=jnp.float32)
    for mode in ("additive", "geometric", "normal"):
        out = jax.block_until_ready(ensemble_layer(x, weight, bias, mode))
        ref = _reference(x, weight, bias, mode)
        if not jnp.allclose(out, ref, atol=1e-5, rtol=1e-5):
            ok = False
            print(f"C={C} mode {mode}: MISMATCH, max abs err = "
                  f"{float(jnp.max(jnp.abs(out - ref)))}")

    # Case 2: C=48 (no folding, g=1) and batch not a multiple of the tile.
    N2, C2 = 20, 48
    x2 = jax.nn.softmax(jax.random.normal(k3, (N2, C2), dtype=jnp.float32), axis=-1)
    weight2 = jax.random.normal(k4, (1, C2), dtype=jnp.float32)
    bias2 = jnp.zeros((1, C2), dtype=jnp.float32)
    for mode in ("additive", "geometric", "normal"):
        out = jax.block_until_ready(ensemble_layer(x2, weight2, bias2, mode))
        ref = _reference(x2, weight2, bias2, mode)
        if not jnp.allclose(out, ref, atol=1e-5, rtol=1e-5):
            ok = False
            print(f"C={C2} mode {mode}: MISMATCH, max abs err = "
                  f"{float(jnp.max(jnp.abs(out - ref)))}")

    if ok:
        print("KERNEL_OK")
</pallas_src>

<mosaic_0001>
module attributes {stable_mosaic.version = 11 : i64} {
  func.func @_ensemble_kernel(%arg0: i32, %arg1: memref<8x128xf32, #tpu.memory_space<vmem>>, %arg2: memref<1x128xf32, #tpu.memory_space<vmem>>, %arg3: memref<1x128xf32, #tpu.memory_space<vmem>>, %arg4: memref<8x128xf32, #tpu.memory_space<vmem>>) attributes {dimension_semantics = [#tpu.dimension_semantics<parallel>], iteration_bounds = array<i64: 1>, scalar_prefetch = 0 : i64, scratch_operands = 0 : i64, tpu.core_type = #tpu.core_type<tc>, window_params = [{transform_indices = @transform_0, window_bounds = array<i64: 8, 128>}, {pipeline_mode = #tpu.pipeline_mode<synchronous>, transform_indices = @transform_1, window_bounds = array<i64: 1, 128>}, {pipeline_mode = #tpu.pipeline_mode<synchronous>, transform_indices = @transform_2, window_bounds = array<i64: 1, 128>}, {transform_indices = @transform_3, window_bounds = array<i64: 8, 128>}]} {
    %c0 = arith.constant 0 : index
    %c0_0 = arith.constant 0 : index
    %0 = vector.load %arg1[%c0, %c0_0] : memref<8x128xf32, #tpu.memory_space<vmem>>, vector<8x128xf32>
    %c0_1 = arith.constant 0 : index
    %c0_2 = arith.constant 0 : index
    %1 = vector.load %arg2[%c0_1, %c0_2] : memref<1x128xf32, #tpu.memory_space<vmem>>, vector<1x128xf32>
    %c0_3 = arith.constant 0 : index
    %c0_4 = arith.constant 0 : index
    %2 = vector.load %arg3[%c0_3, %c0_4] : memref<1x128xf32, #tpu.memory_space<vmem>>, vector<1x128xf32>
    %3 = math.exp %1 : vector<1x128xf32>
    %4 = vector.broadcast %3 : vector<1x128xf32> to vector<8x128xf32>
    %5 = arith.mulf %0, %4 : vector<8x128xf32>
    %6 = math.exp %2 : vector<1x128xf32>
    %7 = vector.broadcast %6 : vector<1x128xf32> to vector<8x128xf32>
    %8 = arith.addf %5, %7 : vector<8x128xf32>
    %9 = vector.extract_strided_slice %8 {offsets = [0, 0], sizes = [8, 32], strides = [1, 1]} : vector<8x128xf32> to vector<8x32xf32>
    %cst = arith.constant dense<0.000000e+00> : vector<8xf32>
    %10 = vector.multi_reduction <add>, %9, %cst [1] : vector<8x32xf32> to vector<8xf32>
    %11 = vector.shape_cast %10 : vector<8xf32> to vector<8x1xf32>
    %12 = vector.shape_cast %11 : vector<8x1xf32> to vector<8x1xf32>
    %13 = vector.broadcast %12 : vector<8x1xf32> to vector<8x32xf32>
    %14 = vector.extract_strided_slice %8 {offsets = [0, 32], sizes = [8, 32], strides = [1, 1]} : vector<8x128xf32> to vector<8x32xf32>
    %cst_5 = arith.constant dense<0.000000e+00> : vector<8xf32>
    %15 = vector.multi_reduction <add>, %14, %cst_5 [1] : vector<8x32xf32> to vector<8xf32>
    %16 = vector.shape_cast %15 : vector<8xf32> to vector<8x1xf32>
    %17 = vector.shape_cast %16 : vector<8x1xf32> to vector<8x1xf32>
    %18 = vector.broadcast %17 : vector<8x1xf32> to vector<8x32xf32>
    %19 = vector.extract_strided_slice %8 {offsets = [0, 64], sizes = [8, 32], strides = [1, 1]} : vector<8x128xf32> to vector<8x32xf32>
    %cst_6 = arith.constant dense<0.000000e+00> : vector<8xf32>
    %20 = vector.multi_reduction <add>, %19, %cst_6 [1] : vector<8x32xf32> to vector<8xf32>
    %21 = vector.shape_cast %20 : vector<8xf32> to vector<8x1xf32>
    %22 = vector.shape_cast %21 : vector<8x1xf32> to vector<8x1xf32>
    %23 = vector.broadcast %22 : vector<8x1xf32> to vector<8x32xf32>
    %24 = vector.extract_strided_slice %8 {offsets = [0, 96], sizes = [8, 32], strides = [1, 1]} : vector<8x128xf32> to vector<8x32xf32>
    %cst_7 = arith.constant dense<0.000000e+00> : vector<8xf32>
    %25 = vector.multi_reduction <add>, %24, %cst_7 [1] : vector<8x32xf32> to vector<8xf32>
    %26 = vector.shape_cast %25 : vector<8xf32> to vector<8x1xf32>
    %27 = vector.shape_cast %26 : vector<8x1xf32> to vector<8x1xf32>
    %28 = vector.broadcast %27 : vector<8x1xf32> to vector<8x32xf32>
    %29 = tpu.concatenate %13, %18, %23, %28 in 1 : vector<8x32xf32>, vector<8x32xf32>, vector<8x32xf32>, vector<8x32xf32> -> vector<8x128xf32>
    %cst_8 = arith.constant 9.99999997E-7 : f32
    %30 = vector.broadcast %cst_8 : f32 to vector<8x128xf32>
    %31 = arith.mulf %30, %29 : vector<8x128xf32>
    %32 = arith.addf %8, %31 : vector<8x128xf32>
    %33 = math.log %32 : vector<8x128xf32>
    %34 = math.log %29 : vector<8x128xf32>
    %35 = arith.subf %33, %34 : vector<8x128xf32>
    %c0_9 = arith.constant 0 : index
    %c0_10 = arith.constant 0 : index
    %36 = vector.load %arg4[%c0_9, %c0_10] : memref<8x128xf32, #tpu.memory_space<vmem>>, vector<8x128xf32>
    tpu.vector_store %arg4[%c0_9, %c0_10], %35 {strides = array<i32>} : memref<8x128xf32, #tpu.memory_space<vmem>>, vector<8x128xf32>,
    return
  }
  func.func @transform_0(%arg0: i32) -> (i32, i32) {
    %c0_i32 = arith.constant 0 : i32
    %c0_i32_0 = arith.constant 0 : i32
    return %arg0, %c0_i32 : i32, i32
  }
  func.func @transform_1(%arg0: i32) -> (i32, i32) {
    %c0_i32 = arith.constant 0 : i32
    %c0_i32_0 = arith.constant 0 : i32
    %c0_i32_1 = arith.constant 0 : i32
    return %c0_i32, %c0_i32_0 : i32, i32
  }
  func.func @transform_2(%arg0: i32) -> (i32, i32) {
    %c0_i32 = arith.constant 0 : i32
    %c0_i32_0 = arith.constant 0 : i32
    %c0_i32_1 = arith.constant 0 : i32
    return %c0_i32, %c0_i32_0 : i32, i32
  }
  func.func @transform_3(%arg0: i32) -> (i32, i32) {
    %c0_i32 = arith.constant 0 : i32
    %c0_i32_0 = arith.constant 0 : i32
    return %arg0, %c0_i32 : i32, i32
  }
}

</mosaic_0001>

<bundles_post_ra>
// kernel: tpu_custom_call.1
= control target key start
LH: loop header
LB: loop body
LE: loop exit
PB: predicated region body
PF: predicated region fallthrough
CT: control target
= control target key end

     0   :  { %8 = vsyncpa [#allocation3], 0  ;;  %s220_s0 = inlined_call_operand.hbm [shape: f32[8,128], index: 0, kind: input, shape index: {}]   ;;  %s221_s1 = inlined_call_operand.vmem [shape: f32[1,128], index: 1, kind: input, shape index: {}]   ;;  %s222_s2 = inlined_call_operand.vmem [shape: f32[1,128], index: 2, kind: input, shape index: {}]   ;;  %s223_s3 = inlined_call_operand.hbm [shape: f32[8,128], index: 3, kind: output, shape index: {}]  }
   0x1   :  { %9 = vsyncpa [#allocation4], 0  ;;  %s160_s12 = smov [#allocation2]   ;;  %s112_s16 = scalar_lea.hbm %s220_s0, 128 }
   0x2   :  { %s16_s13 = sshll.u32 %s160_s12, 4  ;;  %p113_p0 = scmp.ne.s32.totalorder %s220_s0, %s112_s16  ;;  %s17_s13 = int_to_ptr.vmem [resolvable:$true] %s16_s13 }
   0x3   :  { %p116_p1 = scmp.lt.u32.totalorder %s112_s16, %s220_s0 }
   0x5   :  { %p118_p2 = pnand %p116_p1, %p113_p0 }
   0x7   :  { %121 = shalt.err (!%p118_p2)
}
   0x8   :  { %s122_s21 = scalar_lea.vmem %s17_s13, 128  ;;  %p127_p4 = scmp.lt.s32.totalorder %s17_s13, %s17_s13 }
   0x9   :  { %p123_p3 = scmp.ne.s32.totalorder %s17_s13, %s122_s21  ;;  %p128_p5 = scmp.lt.s32.totalorder %s122_s21, %s122_s21 }
   0xb   :  { %p129_p6 = por %p128_p5, %p127_p4 }
   0xd   :  { %p130_p7 = pnand %p129_p6, %p123_p3 }
   0xf   :  { %133 = shalt.err (!%p130_p7)
}
  0x10   :  { %19 = dma.hbm_to_vmem [thread:$0]  %s220_s0, 128, %s17_s13, [#allocation3]  }
  0x11   :  { %156 = dma.done.wait [#allocation3], 128  }
  0x12   :  { %157 = vsyncadd [#allocation3], 4294967168  ;;  %v28_v0 = vld [vmem:[%s221_s1] sm:$0x1]  ;;  %v33_v4 = vlaneseq  ;;  %s161_s0 = smov 96   ;;  %s162_s1 = smov 32  }
  0x13   :  { %v29_v1 = vld [vmem:[%s222_s2] sm:$0x1]  ;;  %v30_v2 = vmul.f32 1.442695, %v28_v0  ;;  %s163_s28 = smov 64   ;;  %vm48_vm0 = vcmask 261120  }
  0x14   :  { %v39_v3 = vmul.f32 1.442695, %v29_v1  ;;  %v34_v5 = vshrl.u32 %v33_v4, 7  ;;  %v27_v8 = vld [vmem:[#allocation2] sm:$0xff]  ;;  %vm72_vm1 = vcmask 523264   ;;  %vm74_vm2 = vcmask 785408  }
  0x15   :  { %104 = vpow2.f32 %v30_v2  ;;  %s164_s2 = smov [#allocation5]  }
  0x16   :  { %106 = vpow2.f32 %v39_v3  ;;  %v35_v6 = vsub.s32 0, %v34_v5  ;;  %s90_s29 = sshll.u32 %s164_s2, 4  ;;  %s91_s29 = int_to_ptr.vmem [resolvable:$true] %s90_s29 }
  0x17   :  { %s134_s30 = scalar_lea.vmem %s91_s29, 128  ;;  %p139_p9 = scmp.lt.s32.totalorder %s91_s29, %s91_s29 }
  0x18   :  { %p135_p8 = scmp.ne.s32.totalorder %s91_s29, %s134_s30  ;;  %p140_p10 = scmp.lt.s32.totalorder %s134_s30, %s134_s30 }
  0x1a   :  { %p141_p11 = por %p140_p10, %p139_p9 }
  0x1c   :  { %p142_p12 = pnand %p141_p11, %p135_p8 }
  0x1f   :  { %v105_v7 = vpop.eup %104 }
  0x20   :  { %v107_v9 = vpop.eup %106  ;;  %v36_v10 = vrot.slane %v105_v7, %v35_v6 }
  0x21   :  { %v45_v11 = vrot.slane %v107_v9, %v35_v6 }
  0x22   :  { %v38_v12 = vmul.f32 %v36_v10, %v27_v8 }
  0x24   :  { %v47_v13 = vadd.f32 %v45_v11, %v38_v12 }
  0x26   :  { %53 = vrot.lane.b32.xlu0 %v47_v13, %s161_s0  ;;  %65 = vrot.lane.b32.xlu1 %v47_v13, %s162_s1  ;;  %v49_v14 = vsel %vm48_vm0, %v47_v13, 0.0 }
  0x2a   :  { %59 = vrot.lane.b32.xlu0 %v47_v13, %s163_s28 }
  0x4a   :  { %50 = vadd.xlane.f32.xlu1 %v49_v14 }
  0x98   :  { %v54_v15 = vpop.permute.xlu0 %53  ;;  %v66_v16 = vpop.permute.xlu1 %65 }
  0x99   :  { %v56_v17 = vsel %vm48_vm0, %v54_v15, 0.0  ;;  %v68_v18 = vsel %vm48_vm0, %v66_v16, 0.0 }
  0x9a   :  { %57 = vadd.xlane.f32.xlu0 %v56_v17  ;;  %69 = vadd.xlane.f32.xlu1 %v68_v18 }
  0x9c   :  { %v60_v19 = vpop.permute.xlu0 %59 }
  0x9d   :  { %v62_v20 = vsel %vm48_vm0, %v60_v19, 0.0 }
  0x9e   :  { %63 = vadd.xlane.f32.xlu0 %v62_v20 }
  0xd7   :  { %v51_v21 = vpop.xlane.xlu1 %50 }
 0x127   :  { %v58_v22 = vpop.xlane.xlu0 %57  ;;  %v70_v23 = vpop.xlane.xlu1 %69 }
 0x128   :  { %v71_v24 = vsel %vm48_vm0, %v51_v21, %v58_v22 }
 0x12b   :  { %v64_v25 = vpop.xlane.xlu0 %63 }
 0x12c   :  { %v73_v26 = vsel %vm72_vm1, %v71_v24, %v64_v25 }
 0x12d   :  { %v75_v27 = vsel %vm74_vm2, %v73_v26, %v70_v23 }
 0x12e   :  { %v76_v28 = vmul.f32 1e-06, %v75_v27  ;;  %108 = vlog2.f32 %v75_v27 }
 0x130   :  { %v77_v29 = vadd.f32 %v76_v28, %v47_v13 }
 0x132   :  { %110 = vlog2.f32 %v77_v29 }
 0x138   :  { %v109_v30 = vpop.eup %108 }
 0x139   :  { %v81_v32 = vmul.f32 0.6931472, %v109_v30 }
 0x13c   :  { %v111_v31 = vpop.eup %110 }
 0x13d   :  { %v79_v33 = vmul.f32 0.6931472, %v111_v31 }
 0x13f   :  { %v82_v34 = vsub.f32 %v79_v33, %v81_v32 }
 0x141   :  { %83 = vst [vmem:[#allocation5] sm:$0xff] %v82_v34 }
 0x142   :  { %145 = shalt.err (!%p142_p12)
}
 0x143   :  { %s146_s6 = scalar_lea.hbm %s223_s3, 128 }
 0x144   :  { %p147_p13 = scmp.ne.s32.totalorder %s223_s3, %s146_s6  ;;  %p150_p0 = scmp.lt.u32.totalorder %s146_s6, %s223_s3 }
 0x146   :  { %p152_p1 = pnand %p150_p0, %p147_p13 }
 0x148   :  { %155 = shalt.err (!%p152_p1)
}
 0x149   :  { %93 = dma.vmem_to_hbm [thread:$0]  %s91_s29, 128, %s223_s3, [#allocation4]  }
 0x14a   :  { %158 = dma.done.wait [#allocation4], 128  }
 0x14b   :  { %159 = vsyncadd [#allocation4], 4294967168 }
 0x14c   :  { %97 = vsyncpa [#allocation3], 1 }
 0x14d   :  { %98 = vsyncpa [#allocation4], 1 }

</bundles_post_ra>
